<compile_context>
chip_gen: v6e
topology: v6e:2x2x1
jax: 0.10.0
libtpu: 0.0.40
codegen_flags: <defaults>
</compile_context>

<pallas_src>
from functools import reduce

import numpy as np
import jax
import jax.numpy as jnp
from jax.experimental import pallas as pl
from jax.experimental.pallas import tpu as pltpu


# ----------------------------------------------------------------------------
# Pallas kernel: fused im2col + linear embedding, one frame per grid step
# ----------------------------------------------------------------------------
def _make_soft_split_kernel(kernel_size, stride, out_hw):
    kh, kw = kernel_size
    sh, sw = stride
    out_h, out_w = out_hw
    L = out_h * out_w
    qh = -(-kh // sh)              # ceil(kh / sh): tap-group rows
    qw = -(-kw // sw)              # ceil(kw / sw): tap-group cols

    def kernel(x_ref, w_ref, b_ref, o_ref):
        # x_ref: (1, Hh, Ww, sh*sw*C)      f32  phase-interleaved padded frame
        # w_ref: (qh*qw, sh*sw*C, hidden)  bf16 group-major embedding weight (resident)
        # b_ref: (1, hidden)               f32
        # o_ref: (1, L, hidden)            f32
        PC = x_ref.shape[-1]
        hidden = w_ref.shape[-1]
        acc = jnp.zeros((L, hidden), jnp.float32)
        # Unrolled loop over the qh*qw tap groups; every slice below is static.
        for qi in range(qh):
            for qj in range(qw):
                g = qi * qw + qj
                win = x_ref[0, qi:qi + out_h, qj:qj + out_w, :]  # (out_h, out_w, PC)
                lhs = win.reshape(L, PC).astype(jnp.bfloat16)    # bf16 MXU operand
                acc = acc + jnp.dot(lhs, w_ref[g],
                                    preferred_element_type=jnp.float32)
        o_ref[0] = (acc + b_ref[...]).astype(o_ref.dtype)

    return kernel


# ----------------------------------------------------------------------------
# SoftSplit forward (same-size XLA glue + fused kernel)
# ----------------------------------------------------------------------------
def soft_split_forward(x, b, params, kernel_size, stride, padding):
    """x: (b*t, C, H, W) f32 -> (b, t*L, hidden) f32. Dropout = identity (eval)."""
    weight, bias = params["weight"], params["bias"]     # (hidden, C*kh*kw), (hidden,)
    N, C, H, W = x.shape
    kh, kw = kernel_size
    sh, sw = stride
    ph, pw = padding
    hidden = weight.shape[0]

    Hp, Wp = H + 2 * ph, W + 2 * pw
    out_h = (Hp - kh) // sh + 1
    out_w = (Wp - kw) // sw + 1
    L = out_h * out_w
    # Round padded spatial dims up to multiples of the stride; the extra rows /
    # cols are never read by any tap-group window.
    Hh = -(-Hp // sh)
    Ww = -(-Wp // sw)
    Hp2, Wp2 = Hh * sh, Ww * sw
    PC = sh * sw * C                                     # lanes per phase cell
    qh, qw = -(-kh // sh), -(-kw // sw)
    nG = qh * qw                                         # tap groups (= MXU matmuls)

    # ---- XLA glue: SAME-SIZE phase-interleave of x (no kh*kw expansion) -----
    xp = jnp.pad(x, ((0, 0), (0, 0),
                     (ph, Hp2 - H - ph), (pw, Wp2 - W - pw)))
    xph = xp.reshape(N, C, Hh, sh, Ww, sw)
    xph = jnp.transpose(xph, (0, 2, 4, 3, 5, 1))         # (N, Hh, Ww, sh, sw, C)
    xph = xph.reshape(N, Hh, Ww, PC)

    # ---- Weight reorg: group-major (nG, PC, hidden), torch.nn.Unfold order --
    # Unfold column index = ch*kh*kw + ki*kw + kj; tap (ki, kj) belongs to group
    # (ki//sh, kj//sw) at lane (ki%sh, kj%sw, ch).  Invalid (out-of-kernel) lanes
    # get zero weight so the general (kernel % stride != 0) case stays correct.
    cols = np.zeros((nG, sh, sw, C), np.int32)
    valid = np.zeros((nG, sh, sw, C), np.float32)
    for qi in range(qh):
        for qj in range(qw):
            g = qi * qw + qj
            for pi in range(sh):
                ki = qi * sh + pi
                for pj in range(sw):
                    kj = qj * sw + pj
                    if ki < kh and kj < kw:
                        cols[g, pi, pj, :] = np.arange(C) * (kh * kw) + ki * kw + kj
                        valid[g, pi, pj, :] = 1.0
    w_g = weight[:, cols.reshape(-1)].T.reshape(nG, PC, hidden)
    if not np.all(valid == 1.0):
        w_g = w_g * valid.reshape(nG, PC, 1)
    w_g = w_g.astype(jnp.bfloat16)
    bias2d = bias.reshape(1, hidden).astype(jnp.float32)

    kernel = _make_soft_split_kernel(kernel_size, stride, (out_h, out_w))

    out = pl.pallas_call(
        kernel,
        out_shape=jax.ShapeDtypeStruct((N, L, hidden), jnp.float32),
        grid_spec=pltpu.PrefetchScalarGridSpec(
            num_scalar_prefetch=0,
            grid=(N,),                                    # one frame per step
            in_specs=[
                pl.BlockSpec((1, Hh, Ww, PC), lambda n: (n, 0, 0, 0)),     # frame
                pl.BlockSpec((nG, PC, hidden), lambda n: (0, 0, 0)),       # weight (resident)
                pl.BlockSpec((1, hidden), lambda n: (0, 0)),               # bias (resident)
            ],
            out_specs=pl.BlockSpec((1, L, hidden), lambda n: (n, 0, 0)),
        ),
        compiler_params=pltpu.CompilerParams(
            dimension_semantics=("parallel",)),
    )(xph, w_g, bias2d)

    # view(b, -1, hidden); dropout = identity in eval mode.
    return out.reshape(b, -1, hidden)


# ----------------------------------------------------------------------------
# Pure-JAX reference (torch.nn.Unfold semantics) for the sanity check
# ----------------------------------------------------------------------------
def im2col_nchw(x, kernel_size, stride, padding):
    """Returns (N, C*kh*kw, L) with column ordering c*kh*kw + ki*kw + kj."""
    N, C, Hs, Ws = x.shape
    kh, kw = kernel_size
    sh, sw = stride
    ph, pw = padding
    xp = jnp.pad(x, ((0, 0), (0, 0), (ph, ph), (pw, pw)))
    out_h = (Hs + 2 * ph - kh) // sh + 1
    out_w = (Ws + 2 * pw - kw) // sw + 1
    cols = []
    for i in range(kh):
        for j in range(kw):
            cols.append(xp[:, :, i:i + out_h * sh:sh, j:j + out_w * sw:sw])
    patches = jnp.stack(cols, axis=2)                    # (N, C, kh*kw, oh, ow)
    return patches.reshape(N, C * kh * kw, out_h * out_w)


# ----------------------------------------------------------------------------
# main
# ----------------------------------------------------------------------------
if __name__ == "__main__":
    # Module config
    channel = 4
    hidden = 32
    kernel_size = (4, 4)
    stride = (2, 2)
    padding = (1, 1)
    c_in = reduce(lambda a, c: a * c, kernel_size) * channel   # 64

    # Deterministic parameters (synthetic init, nn.Linear shapes)
    key = jax.random.PRNGKey(0)
    k_w, k_b, k_x = jax.random.split(key, 3)
    bound = 1.0 / (c_in ** 0.5)
    params = {
        "weight": jax.random.uniform(k_w, (hidden, c_in), jnp.float32, -bound, bound),
        "bias": jax.random.uniform(k_b, (hidden,), jnp.float32, -bound, bound),
    }

    # Example input: x is (b*t, C, H, W) with b=2, t=1
    b = 2
    x = jax.random.normal(k_x, (2, channel, 16, 16), jnp.float32)

    fwd = jax.jit(soft_split_forward, static_argnums=(1, 3, 4, 5))
    out = fwd(x, b, params, kernel_size, stride, padding)
    out = jax.block_until_ready(out)

    # References
    feat = jnp.transpose(im2col_nchw(x, kernel_size, stride, padding), (0, 2, 1))
    # bf16-consistent reference (kernel multiplies bf16-rounded operands, f32 accum)
    feat_bf = feat.astype(jnp.bfloat16).astype(jnp.float32)
    w_bf = params["weight"].astype(jnp.bfloat16).astype(jnp.float32)
    ref_bf = (feat_bf @ w_bf.T + params["bias"]).reshape(b, -1, hidden)
    # full-f32 reference (semantic sanity check at looser tolerance)
    ref_f32 = (feat @ params["weight"].T + params["bias"]).reshape(b, -1, hidden)

    assert out.shape == (b, (x.shape[0] // b) * 64, hidden)
    assert jnp.allclose(out, ref_bf, atol=1e-3, rtol=1e-3), \
        float(jnp.max(jnp.abs(out - ref_bf)))
    assert jnp.allclose(out, ref_f32, atol=5e-2, rtol=5e-2), \
        float(jnp.max(jnp.abs(out - ref_f32)))

    print("KERNEL_OK")
</pallas_src>

<mosaic_0001>
module attributes {stable_mosaic.version = 11 : i64} {
  func.func @kernel(%arg0: i32, %arg1: memref<1x9x9x16xf32, #tpu.memory_space<vmem>>, %arg2: memref<4x16x32xbf16, #tpu.memory_space<vmem>>, %arg3: memref<1x32xf32, #tpu.memory_space<vmem>>, %arg4: memref<1x64x32xf32, #tpu.memory_space<vmem>>) attributes {dimension_semantics = [#tpu.dimension_semantics<parallel>], iteration_bounds = array<i64: 2>, scalar_prefetch = 0 : i64, scratch_operands = 0 : i64, tpu.core_type = #tpu.core_type<tc>, window_params = [{transform_indices = @transform_0, window_bounds = array<i64: 1, 9, 9, 16>}, {pipeline_mode = #tpu.pipeline_mode<synchronous>, transform_indices = @transform_1, window_bounds = array<i64: 4, 16, 32>}, {pipeline_mode = #tpu.pipeline_mode<synchronous>, transform_indices = @transform_2, window_bounds = array<i64: 1, 32>}, {transform_indices = @transform_3, window_bounds = array<i64: 1, 64, 32>}]} {
    %cst = arith.constant 0.000000e+00 : f32
    %0 = vector.broadcast %cst : f32 to vector<64x32xf32>
    %c0 = arith.constant 0 : index
    %c0_0 = arith.constant 0 : index
    %c0_1 = arith.constant 0 : index
    %c0_2 = arith.constant 0 : index
    %1 = vector.load %arg1[%c0, %c0_0, %c0_1, %c0_2] : memref<1x9x9x16xf32, #tpu.memory_space<vmem>>, vector<1x8x8x16xf32>
    %2 = vector.shape_cast %1 : vector<1x8x8x16xf32> to vector<8x8x16xf32>
    %3 = vector.shape_cast %2 : vector<8x8x16xf32> to vector<64x16xf32>
    %4 = arith.truncf %3 : vector<64x16xf32> to vector<64x16xbf16>
    %c0_3 = arith.constant 0 : index
    %c0_4 = arith.constant 0 : index
    %c0_5 = arith.constant 0 : index
    %5 = vector.load %arg2[%c0_3, %c0_4, %c0_5] : memref<4x16x32xbf16, #tpu.memory_space<vmem>>, vector<1x16x32xbf16>
    %6 = vector.shape_cast %5 : vector<1x16x32xbf16> to vector<16x32xbf16>
    %cst_6 = arith.constant dense<0.000000e+00> : vector<64x32xf32>
    %7 = tpu.matmul %4, %6, %cst_6 {dimension_numbers = #tpu.dot_dimension_numbers<[1], [0], [0], [1], [0, 0, 1, 1], [], []>} : vector<64x16xbf16>, vector<16x32xbf16>, vector<64x32xf32> -> vector<64x32xf32>
    %8 = arith.addf %0, %7 : vector<64x32xf32>
    %c0_7 = arith.constant 0 : index
    %c0_8 = arith.constant 0 : index
    %c1 = arith.constant 1 : index
    %c0_9 = arith.constant 0 : index
    %9 = vector.load %arg1[%c0_7, %c0_8, %c1, %c0_9] : memref<1x9x9x16xf32, #tpu.memory_space<vmem>>, vector<1x8x8x16xf32>
    %10 = vector.shape_cast %9 : vector<1x8x8x16xf32> to vector<8x8x16xf32>
    %11 = vector.shape_cast %10 : vector<8x8x16xf32> to vector<64x16xf32>
    %12 = arith.truncf %11 : vector<64x16xf32> to vector<64x16xbf16>
    %c1_10 = arith.constant 1 : index
    %c0_11 = arith.constant 0 : index
    %c0_12 = arith.constant 0 : index
    %13 = vector.load %arg2[%c1_10, %c0_11, %c0_12] : memref<4x16x32xbf16, #tpu.memory_space<vmem>>, vector<1x16x32xbf16>
    %14 = vector.shape_cast %13 : vector<1x16x32xbf16> to vector<16x32xbf16>
    %cst_13 = arith.constant dense<0.000000e+00> : vector<64x32xf32>
    %15 = tpu.matmul %12, %14, %cst_13 {dimension_numbers = #tpu.dot_dimension_numbers<[1], [0], [0], [1], [0, 0, 1, 1], [], []>} : vector<64x16xbf16>, vector<16x32xbf16>, vector<64x32xf32> -> vector<64x32xf32>
    %16 = arith.addf %8, %15 : vector<64x32xf32>
    %c0_14 = arith.constant 0 : index
    %c1_15 = arith.constant 1 : index
    %c0_16 = arith.constant 0 : index
    %c0_17 = arith.constant 0 : index
    %17 = vector.load %arg1[%c0_14, %c1_15, %c0_16, %c0_17] : memref<1x9x9x16xf32, #tpu.memory_space<vmem>>, vector<1x8x8x16xf32>
    %18 = vector.shape_cast %17 : vector<1x8x8x16xf32> to vector<8x8x16xf32>
    %19 = vector.shape_cast %18 : vector<8x8x16xf32> to vector<64x16xf32>
    %20 = arith.truncf %19 : vector<64x16xf32> to vector<64x16xbf16>
    %c2 = arith.constant 2 : index
    %c0_18 = arith.constant 0 : index
    %c0_19 = arith.constant 0 : index
    %21 = vector.load %arg2[%c2, %c0_18, %c0_19] : memref<4x16x32xbf16, #tpu.memory_space<vmem>>, vector<1x16x32xbf16>
    %22 = vector.shape_cast %21 : vector<1x16x32xbf16> to vector<16x32xbf16>
    %cst_20 = arith.constant dense<0.000000e+00> : vector<64x32xf32>
    %23 = tpu.matmul %20, %22, %cst_20 {dimension_numbers = #tpu.dot_dimension_numbers<[1], [0], [0], [1], [0, 0, 1, 1], [], []>} : vector<64x16xbf16>, vector<16x32xbf16>, vector<64x32xf32> -> vector<64x32xf32>
    %24 = arith.addf %16, %23 : vector<64x32xf32>
    %c0_21 = arith.constant 0 : index
    %c1_22 = arith.constant 1 : index
    %c1_23 = arith.constant 1 : index
    %c0_24 = arith.constant 0 : index
    %25 = vector.load %arg1[%c0_21, %c1_22, %c1_23, %c0_24] : memref<1x9x9x16xf32, #tpu.memory_space<vmem>>, vector<1x8x8x16xf32>
    %26 = vector.shape_cast %25 : vector<1x8x8x16xf32> to vector<8x8x16xf32>
    %27 = vector.shape_cast %26 : vector<8x8x16xf32> to vector<64x16xf32>
    %28 = arith.truncf %27 : vector<64x16xf32> to vector<64x16xbf16>
    %c3 = arith.constant 3 : index
    %c0_25 = arith.constant 0 : index
    %c0_26 = arith.constant 0 : index
    %29 = vector.load %arg2[%c3, %c0_25, %c0_26] : memref<4x16x32xbf16, #tpu.memory_space<vmem>>, vector<1x16x32xbf16>
    %30 = vector.shape_cast %29 : vector<1x16x32xbf16> to vector<16x32xbf16>
    %cst_27 = arith.constant dense<0.000000e+00> : vector<64x32xf32>
    %31 = tpu.matmul %28, %30, %cst_27 {dimension_numbers = #tpu.dot_dimension_numbers<[1], [0], [0], [1], [0, 0, 1, 1], [], []>} : vector<64x16xbf16>, vector<16x32xbf16>, vector<64x32xf32> -> vector<64x32xf32>
    %32 = arith.addf %24, %31 : vector<64x32xf32>
    %c0_28 = arith.constant 0 : index
    %c0_29 = arith.constant 0 : index
    %33 = vector.load %arg3[%c0_28, %c0_29] : memref<1x32xf32, #tpu.memory_space<vmem>>, vector<1x32xf32>
    %34 = vector.broadcast %33 : vector<1x32xf32> to vector<64x32xf32>
    %35 = arith.addf %32, %34 : vector<64x32xf32>
    %c0_30 = arith.constant 0 : index
    %c0_31 = arith.constant 0 : index
    %c0_32 = arith.constant 0 : index
    %36 = vector.load %arg4[%c0_30, %c0_31, %c0_32] : memref<1x64x32xf32, #tpu.memory_space<vmem>>, vector<1x64x32xf32>
    %37 = vector.shape_cast %36 : vector<1x64x32xf32> to vector<64x32xf32>
    %38 = vector.shape_cast %35 : vector<64x32xf32> to vector<1x64x32xf32>
    tpu.vector_store %arg4[%c0_30, %c0_31, %c0_32], %38 {strides = array<i32>} : memref<1x64x32xf32, #tpu.memory_space<vmem>>, vector<1x64x32xf32>,
    return
  }
  func.func @transform_0(%arg0: i32) -> (i32, i32, i32, i32) {
    %c0_i32 = arith.constant 0 : i32
    %c0_i32_0 = arith.constant 0 : i32
    %c0_i32_1 = arith.constant 0 : i32
    %c0_i32_2 = arith.constant 0 : i32
    return %arg0, %c0_i32, %c0_i32_0, %c0_i32_1 : i32, i32, i32, i32
  }
  func.func @transform_1(%arg0: i32) -> (i32, i32, i32) {
    %c0_i32 = arith.constant 0 : i32
    %c0_i32_0 = arith.constant 0 : i32
    %c0_i32_1 = arith.constant 0 : i32
    %c0_i32_2 = arith.constant 0 : i32
    return %c0_i32, %c0_i32_0, %c0_i32_1 : i32, i32, i32
  }
  func.func @transform_2(%arg0: i32) -> (i32, i32) {
    %c0_i32 = arith.constant 0 : i32
    %c0_i32_0 = arith.constant 0 : i32
    %c0_i32_1 = arith.constant 0 : i32
    return %c0_i32, %c0_i32_0 : i32, i32
  }
  func.func @transform_3(%arg0: i32) -> (i32, i32, i32) {
    %c0_i32 = arith.constant 0 : i32
    %c0_i32_0 = arith.constant 0 : i32
    %c0_i32_1 = arith.constant 0 : i32
    return %arg0, %c0_i32, %c0_i32_0 : i32, i32, i32
  }
}

</mosaic_0001>

<bundles_post_ra>
// kernel: soft_split_forward.1
= control target key start
LH: loop header
LB: loop body
LE: loop exit
PB: predicated region body
PF: predicated region fallthrough
CT: control target
= control target key end

     0   :  { %s815_s12 = smov 0   ;;  %s905_s0 = inlined_call_operand.vmem [shape: f32[2,9,9,16], index: 0, kind: input, shape index: {}]   ;;  %s906_s1 = inlined_call_operand.vmem [shape: bf16[4,16,32], index: 1, kind: input, shape index: {}]   ;;  %s907_s2 = inlined_call_operand.vmem [shape: f32[1,32], index: 2, kind: input, shape index: {}]   ;;  %s908_s3 = inlined_call_operand.vmem [shape: f32[2,64,32], index: 3, kind: output, shape index: {}]  }
   0x1 LB: > { %s660_s13 = sadd.s32 4294967295, %s793_s12   ;;  %p664_p0 = scmp.ge.s32.totalorder %s793_s12, 1  ;;  %s793_s12 = sphi %s815_s12, %s13_s12  }
   0x2   : > { %p137_p1 = scmp.lt.s32.totalorder %s793_s12, 3 }
   0x4   : > { %p138_p2 = pnand %p664_p0, %p137_p1 }
   0x5   : > { %p161_p3 = scmp.lt.s32.totalorder (!%p138_p2), %s660_s13, 1 }
   0x6   : > { %141 = sbr.rel (%p138_p2) target bundleno = 250 (0xfa), region = 32 }
   0xb   : > { %v783_v0 = vld [vmem:[%s906_s1 + $0x8] sm:$0xff]   ;;  %v784_v1 = vld [vmem:[%s906_s1] sm:$0xff]   ;;  %s910_s13 = smov (!%p161_p3, %s660_s13), 1  ;;  %v785_v2 = vld [vmem:[%s906_s1 + $0x10] sm:$0xff]   ;;  %vm207_vm0 = vcmask 130048   ;;  %vm596_vm1 = vcmask 261120  }
   0xc   : > { %734 = vmatprep.subr.bf16.mxu0 %v783_v0  ;;  %744 = vmatprep.subr.bf16.mxu1 %v784_v1  ;;  %v786_v3 = vld [vmem:[%s906_s1 + $0x18] sm:$0xff]   ;;  %s774_s22 = smul.u32 144, %s910_s13  ;;  %s713_s26 = sshll.u32 %s910_s13, 6  ;;  %v710_v59 = vld [vmem:[%s907_s2] ss:$0 sm:$0xff] }
   0xd   : > { %735 = vmatpush3.bf16.msra.mxu0 %v783_v0  ;;  %745 = vmatpush3.bf16.msra.mxu1 %v784_v1  ;;  %s884_s4 = scalar_lea.vmem %s908_s3, %s713_s26 }
   0xe   : > { %754 = vmatprep.subr.bf16.mxu0 %v785_v2  ;;  %764 = vmatprep.subr.bf16.mxu1 %v786_v3  ;;  %s841_s25 = scalar_lea.vmem %s905_s0, %s774_s22 }
   0xf   : > { %v186_v4 = vld [vmem:[%s841_s25 + $0x1] sm:$0xff]  ;;  %v187_v5 = vld [vmem:[%s841_s25 + $0x11] sm:$0xff] }
  0x10   : > { %v172_v6 = vld [vmem:[%s841_s25] sm:$0xff]  ;;  %v194_v7 = vpack.c.bf16 %v187_v5, %v186_v4  ;;  %v173_v8 = vld [vmem:[%s841_s25 + $0x10] sm:$0xff] }
  0x11   : > { %v188_v9 = vld [vmem:[%s841_s25 + $0x21] sm:$0xff]  ;;  %v189_v10 = vld [vmem:[%s841_s25 + $0x31] sm:$0xff]  ;;  %v180_v11 = vpack.c.bf16 %v173_v8, %v172_v6 }
  0x12   : > { %v195_v12 = vpack.c.bf16 %v189_v10, %v188_v9  ;;  %v174_v13 = vld [vmem:[%s841_s25 + $0x20] sm:$0xff]  ;;  %v175_v14 = vld [vmem:[%s841_s25 + $0x30] sm:$0xff]  ;;  %736 = vmatprep.mubr.msk.bf16.mxu0 %vm207_vm0, %v194_v7  ;;  %v483_v29 = vpack.c.bf16 %v188_v9, %v187_v5 }
  0x13   : > { %v190_v15 = vld [vmem:[%s841_s25 + $0x41] sm:$0xff]  ;;  %v181_v16 = vpack.c.bf16 %v175_v14, %v174_v13  ;;  %v191_v17 = vld [vmem:[%s841_s25 + $0x51] sm:$0xff]  ;;  %746 = vmatprep.mubr.msk.bf16.mxu1 %vm207_vm0, %v180_v11  ;;  %v377_v28 = vpack.c.bf16 %v174_v13, %v173_v8 }
  0x14   : > { %v176_v18 = vld [vmem:[%s841_s25 + $0x40] sm:$0xff]  ;;  %v177_v19 = vld [vmem:[%s841_s25 + $0x50] sm:$0xff]  ;;  %737 = vmatmul.mubr.msk.bf16.vlgmr.msra.gmra.mxu0 %vm207_vm0, %v195_v12  ;;  %v196_v20 = vpack.c.bf16 %v191_v17, %v190_v15  ;;  %v484_v31 = vpack.c.bf16 %v190_v15, %v189_v10 }
  0x15   : > { %v182_v21 = vpack.c.bf16 %v177_v19, %v176_v18  ;;  %747 = vmatmul.mubr.msk.bf16.vlgmr.msra.gmra.mxu1 %vm207_vm0, %v181_v16  ;;  %755 = vmatpush3.bf16.msra.mxu0 %v785_v2  ;;  %v192_v22 = vld [vmem:[%s841_s25 + $0x61] sm:$0xff]  ;;  %v193_v23 = vld [vmem:[%s841_s25 + $0x71] sm:$0xff]  ;;  %v378_v30 = vpack.c.bf16 %v176_v18, %v175_v14 }
  0x16   : > { %765 = vmatpush3.bf16.msra.mxu1 %v786_v3  ;;  %740 = vmatprep.mubr.msk.bf16.mxu0 %vm207_vm0, %v196_v20  ;;  %v178_v24 = vld [vmem:[%s841_s25 + $0x60] sm:$0xff]  ;;  %v179_v25 = vld [vmem:[%s841_s25 + $0x70] sm:$0xff]  ;;  %v197_v26 = vpack.c.bf16 %v193_v23, %v192_v22  ;;  %v485_v33 = vpack.c.bf16 %v192_v22, %v191_v17 }
  0x17   : > { %750 = vmatprep.mubr.msk.bf16.mxu1 %vm207_vm0, %v182_v21  ;;  %v183_v27 = vpack.c.bf16 %v179_v25, %v178_v24  ;;  %v379_v32 = vpack.c.bf16 %v178_v24, %v177_v19  ;;  %v687_v34 = vld [vmem:[%s841_s25 + $0x80] sm:$0xff] }
  0x18   : > { %v702_v35 = vld [vmem:[%s841_s25 + $0x81] sm:$0xff]  ;;  %v380_v36 = vpack.c.bf16 %v687_v34, %v179_v25 }
  0x19   : > { %v486_v37 = vpack.c.bf16 %v702_v35, %v193_v23 }
  0x1c   : > { %741 = vmatmul.mubr.msk.bf16.gmra.mxu0 %vm207_vm0, %v197_v26 }
  0x1d   : > { %751 = vmatmul.mubr.msk.bf16.gmra.mxu1 %vm207_vm0, %v183_v27  ;;  %756 = vmatprep.mubr.msk.bf16.mxu0 %vm207_vm0, %v377_v28 }
  0x1e   : > { %766 = vmatprep.mubr.msk.bf16.mxu1 %vm207_vm0, %v483_v29 }
  0x24   : > { %757 = vmatmul.mubr.msk.bf16.vlgmr.msra.gmra.mxu0 %vm207_vm0, %v378_v30 }
  0x25   : > { %767 = vmatmul.mubr.msk.bf16.vlgmr.msra.gmra.mxu1 %vm207_vm0, %v484_v31  ;;  %760 = vmatprep.mubr.msk.bf16.mxu0 %vm207_vm0, %v379_v32 }
  0x26   : > { %770 = vmatprep.mubr.msk.bf16.mxu1 %vm207_vm0, %v485_v33 }
  0x2c   : > { %761 = vmatmul.mubr.msk.bf16.gmra.mxu0 %vm207_vm0, %v380_v36 }
  0x2d   : > { %771 = vmatmul.mubr.msk.bf16.gmra.mxu1 %vm207_vm0, %v486_v37 }
  0xd4   : > { %v738_v38 = vpop.f32.mrf.mxu0 }
  0xd5   : > { %v748_v39 = vpop.f32.mrf.mxu1 }
  0xd6   : > { %v254_v40 = vpop.f32.mrf.mxu0  ;;  %v346_v53 = vadd.f32 %v748_v39, %v738_v38 }
  0xd7   : > { %v337_v41 = vpop.f32.mrf.mxu1 }
  0xd8   : > { %v739_v42 = vpop.f32.mrf.mxu0  ;;  %v338_v56 = vadd.f32 %v337_v41, %v254_v40 }
  0xd9   : > { %v749_v43 = vpop.f32.mrf.mxu1 }
  0xda   : > { %v257_v44 = vpop.f32.mrf.mxu0  ;;  %v349_v61 = vadd.f32 %v749_v43, %v739_v42 }
  0xdb   : > { %v340_v45 = vpop.f32.mrf.mxu1 }
  0xdc   : > { %v742_v46 = vpop.f32.mrf.mxu0  ;;  %v341_v2 = vadd.f32 %v340_v45, %v257_v44 }
  0xdd   : > { %v752_v47 = vpop.f32.mrf.mxu1 }
  0xde   : > { %v270_v48 = vpop.f32.mrf.mxu0  ;;  %v362_v8 = vadd.f32 %v752_v47, %v742_v46 }
  0xdf   : > { %v353_v49 = vpop.f32.mrf.mxu1 }
  0xe0   : > { %v743_v50 = vpop.f32.mrf.mxu0  ;;  %v354_v14 = vadd.f32 %v353_v49, %v270_v48 }
  0xe1   : > { %v753_v51 = vpop.f32.mrf.mxu1 }
  0xe2   : > { %v273_v52 = vpop.f32.mrf.mxu0  ;;  %v365_v20 = vadd.f32 %v753_v51, %v743_v50 }
  0xe3   : > { %v356_v54 = vpop.f32.mrf.mxu1 }
  0xe4   : > { %v758_v55 = vpop.f32.mrf.mxu0  ;;  %v357_v26 = vadd.f32 %v356_v54, %v273_v52 }
  0xe5   : > { %v469_v57 = vadd.f32 %v758_v55, %v346_v53  ;;  %v768_v58 = vpop.f32.mrf.mxu1 }
  0xe6   : > { %v436_v60 = vpop.f32.mrf.mxu0 }
  0xe7   : > { %v575_v62 = vadd.f32 %v768_v58, %v469_v57  ;;  %v467_v63 = vadd.f32 %v436_v60, %v338_v56  ;;  %v542_v0 = vpop.f32.mrf.mxu1 }
  0xe8   : > { %v759_v1 = vpop.f32.mrf.mxu0 }
  0xe9   : > { %v590_v3 = vadd.f32 %v710_v59, %v575_v62  ;;  %v573_v4 = vadd.f32 %v542_v0, %v467_v63  ;;  %v470_v5 = vadd.f32 %v759_v1, %v349_v61  ;;  %v769_v6 = vpop.f32.mrf.mxu1 }
  0xea   : > { %v439_v7 = vpop.f32.mrf.mxu0 }
  0xeb   : > { %599 = vst.msk [vmem:[%s884_s4 + $0x10] sm:$0xff] %vm596_vm1, %v590_v3  ;;  %v588_v9 = vadd.f32 %v710_v59, %v573_v4  ;;  %v576_v10 = vadd.f32 %v769_v6, %v470_v5  ;;  %v468_v11 = vadd.f32 %v439_v7, %v341_v2  ;;  %v545_v12 = vpop.f32.mrf.mxu1 }
  0xec   : > { %v762_v13 = vpop.f32.mrf.mxu0 }
  0xed   : > { %597 = vst.msk [vmem:[%s884_s4] sm:$0xff] %vm596_vm1, %v588_v9  ;;  %v591_v15 = vadd.f32 %v710_v59, %v576_v10  ;;  %v574_v16 = vadd.f32 %v545_v12, %v468_v11  ;;  %v473_v17 = vadd.f32 %v762_v13, %v362_v8  ;;  %v772_v18 = vpop.f32.mrf.mxu1 }
  0xee   : > { %v452_v19 = vpop.f32.mrf.mxu0 }
  0xef   : > { %600 = vst.msk [vmem:[%s884_s4 + $0x18] sm:$0xff] %vm596_vm1, %v591_v15  ;;  %v589_v21 = vadd.f32 %v710_v59, %v574_v16  ;;  %v579_v22 = vadd.f32 %v772_v18, %v473_v17  ;;  %v471_v23 = vadd.f32 %v452_v19, %v354_v14  ;;  %v558_v24 = vpop.f32.mrf.mxu1 }
  0xf0   : > { %v763_v25 = vpop.f32.mrf.mxu0 }
  0xf1   : > { %598 = vst.msk [vmem:[%s884_s4 + $0x8] sm:$0xff] %vm596_vm1, %v589_v21  ;;  %v594_v27 = vadd.f32 %v710_v59, %v579_v22  ;;  %v577_v28 = vadd.f32 %v558_v24, %v471_v23  ;;  %v474_v29 = vadd.f32 %v763_v25, %v365_v20  ;;  %v773_v30 = vpop.f32.mrf.mxu1 }
  0xf2   : > { %v455_v31 = vpop.f32.mrf.mxu0 }
  0xf3   : > { %603 = vst.msk [vmem:[%s884_s4 + $0x30] sm:$0xff] %vm596_vm1, %v594_v27  ;;  %v592_v32 = vadd.f32 %v710_v59, %v577_v28  ;;  %v580_v33 = vadd.f32 %v773_v30, %v474_v29  ;;  %v472_v34 = vadd.f32 %v455_v31, %v357_v26  ;;  %v561_v35 = vpop.f32.mrf.mxu1 }
  0xf5   : > { %601 = vst.msk [vmem:[%s884_s4 + $0x20] sm:$0xff] %vm596_vm1, %v592_v32  ;;  %v595_v36 = vadd.f32 %v710_v59, %v580_v33  ;;  %v578_v37 = vadd.f32 %v561_v35, %v472_v34 }
  0xf7   : > { %604 = vst.msk [vmem:[%s884_s4 + $0x38] sm:$0xff] %vm596_vm1, %v595_v36  ;;  %v593_v38 = vadd.f32 %v710_v59, %v578_v37 }
  0xf9   : > { %602 = vst.msk [vmem:[%s884_s4 + $0x28] sm:$0xff] %vm596_vm1, %v593_v38 }
  0xfa PF: > { %s13_s12 = sadd.s32 1, %s793_s12  }
  0xfb   : > { %p10_p4 = scmp.ge.s32.totalorder %s13_s12, 4  }
  0xfd   :  { %12 = sbr.rel (!%p10_p4) target bundleno = 1 (0x1), region = 66 }

</bundles_post_ra>
